<compile_context>
chip_gen: v5e
topology: v5e:2x2
jax: 0.10.0
libtpu: 0.0.40
codegen_flags: <defaults>
</compile_context>

<pallas_src>
import functools

import jax
import jax.numpy as jnp
from jax import lax
from jax.experimental import pallas as pl
from jax.experimental.pallas import tpu as pltpu

LANES = 128
SUBLANES = 8
GROUP = SUBLANES * LANES          # 1024 elems: main/tail split granularity
MAX_BLOCK_ROWS = 8192             # (8192,128) f32 = 4 MiB per input block


def _cdiv(a, b):
    return -(-a // b)


def _num_tensorcores():
    """Best-effort TensorCores per JAX device: 2 on v7x, 1 on v5e/v6e."""
    try:
        kind = jax.devices()[0].device_kind.lower()
    except Exception:
        return 1
    return 2 if ("v7" in kind or "7x" in kind) else 1


def _focal_kernel(x_ref, t_ref, sb_ref, st_ref, *, gamma, block_rows,
                  blocks_per_core, blocks_total, rows_valid, needs_mask):
    p = pl.program_id(0)
    i = pl.program_id(1)

    # Output blocks are resident across the inner ("arbitrary") axis: init once.
    @pl.when(i == 0)
    def _():
        sb_ref[...] = jnp.zeros_like(sb_ref)
        st_ref[...] = jnp.zeros_like(st_ref)

    # Cast in-kernel so HBM reads stay in the caller's (possibly narrow) dtype.
    x = x_ref[...].astype(jnp.float32)      # (block_rows, 128)
    t = t_ref[...].astype(jnp.float32)

    def accum(xv, tv):
        proba = jax.nn.sigmoid(xv)
        diff = jnp.abs(tv - proba)
        lg = jnp.log1p(-diff)               # == log(1 - diff), safer near 0
        # gamma is a Python int by default -> integer_pow -> VPU multiplies.
        base = -(diff * lg ** gamma)
        # Fold the block into the lane-dense (8,128) accumulators with plain
        # VPU adds: no per-step cross-lane reduce, no narrow masked stores.
        # (block_rows is always a multiple of 8, so this reshape is tile-exact.)
        sb_ref[...] += jnp.sum(base.reshape(-1, SUBLANES, LANES), axis=0)
        st_ref[...] += jnp.sum(tv.reshape(-1, SUBLANES, LANES), axis=0)

    if not needs_mask:
        accum(x, t)
    else:
        tb = p * blocks_per_core + i        # true (unclamped) block index
        ragged = (rows_valid % block_rows) != 0
        first_masked = blocks_total - 1 if ragged else blocks_total

        @pl.when(tb < first_masked)
        def _():
            accum(x, t)

        @pl.when(tb >= first_masked)
        def _():
            # Rows >= rows_valid are garbage (ragged last block) or duplicates
            # (grid rounded up to ncores*blocks_per_core; index_map clamps them
            # onto the last real block).  Force x=0, t=0.5 there:
            # sigmoid(0)=0.5 -> diff=0 -> base=0; the 0.5 target contribution
            # is removed analytically in the wrapper.
            row = lax.broadcasted_iota(jnp.int32, (block_rows, LANES), 0)
            valid = (tb * block_rows + row) < rows_valid
            accum(jnp.where(valid, x, 0.0), jnp.where(valid, t, 0.5))


def binary_dual_focal_loss(x, target, *, gamma=2, pos_weight=None):
    """Equivalent of BinaryDualFocalLoss(gamma, pos_weight=pos_weight)(x, target)
    with the defaults reduction=True, weight=None."""
    n = x.size
    xf = x.reshape(-1)                      # contiguous flatten: free
    tf = target.reshape(-1)
    if tf.dtype == jnp.bool_:
        tf = tf.astype(jnp.int8)            # 1 B/elem; f32 cast happens in-kernel

    # Kernel handles the largest multiple of 1024 elements with zero padding;
    # the (<1024-element) leftover tail, if any, is folded in with plain jnp.
    n_main = (n // GROUP) * GROUP
    n_tail = n - n_main

    sum_base = jnp.float32(0.0)
    sum_t = jnp.float32(0.0)

    if n_main:
        rows = n_main // LANES              # always a multiple of 8
        # When n_tail == 0 these reshapes are free bitcasts (no HBM copy).
        xm = (xf if n_tail == 0 else xf[:n_main]).reshape(rows, LANES)
        tm = (tf if n_tail == 0 else tf[:n_main]).reshape(rows, LANES)

        block_rows = min(MAX_BLOCK_ROWS, rows)
        blocks_total = _cdiv(rows, block_rows)
        ncores = min(_num_tensorcores(), blocks_total)
        bpc = _cdiv(blocks_total, ncores)
        covered_rows = ncores * bpc * block_rows
        dummy_elems = covered_rows * LANES - n_main   # masked positions (t := 0.5)
        needs_mask = covered_rows != rows

        kernel = functools.partial(
            _focal_kernel, gamma=gamma, block_rows=block_rows,
            blocks_per_core=bpc, blocks_total=blocks_total, rows_valid=rows,
            needs_mask=needs_mask)

        def in_map(p, i):
            # Clamp round-up duplicate blocks onto the last real block so the
            # DMA never walks past the array; the kernel masks them to zero.
            return (jnp.minimum(p * bpc + i, blocks_total - 1), 0)

        sb, st = pl.pallas_call(
            kernel,
            out_shape=(
                jax.ShapeDtypeStruct((ncores * SUBLANES, LANES), jnp.float32),
                jax.ShapeDtypeStruct((ncores * SUBLANES, LANES), jnp.float32),
            ),
            grid_spec=pltpu.PrefetchScalarGridSpec(
                num_scalar_prefetch=0,
                grid=(ncores, bpc),
                in_specs=[
                    pl.BlockSpec((block_rows, LANES), in_map),
                    pl.BlockSpec((block_rows, LANES), in_map),
                ],
                out_specs=(
                    pl.BlockSpec((SUBLANES, LANES), lambda p, i: (p, 0)),
                    pl.BlockSpec((SUBLANES, LANES), lambda p, i: (p, 0)),
                ),
            ),
            compiler_params=pltpu.CompilerParams(
                # Leading axis = per-core accumulators ("parallel" shards grid
                # axes across TensorCores on multi-TC chips); the inner axis
                # carries the resident accumulator -> "arbitrary".
                dimension_semantics=("parallel", "arbitrary"),
                vmem_limit_bytes=48 * 1024 * 1024,
            ),
        )(xm, tm)

        sum_base = jnp.sum(sb)                        # masked elements contribute 0
        sum_t = jnp.sum(st) - 0.5 * dummy_elems       # drop the t=0.5 dummies

    if n_tail:
        xt = xf[n_main:].astype(jnp.float32)
        tt = tf[n_main:].astype(jnp.float32)
        proba = jax.nn.sigmoid(xt)
        diff = jnp.abs(tt - proba)
        sum_base = sum_base + jnp.sum(-(diff * jnp.log1p(-diff) ** gamma))
        sum_t = sum_t + jnp.sum(tt)

    if pos_weight is not None:
        sum_w = (float(pos_weight) - 1.0) * sum_t + n
    else:
        sum_w = sum_t + 2.0 * n                       # sum(target + 2.0)

    # torch: base (N,) * weight (N,1) -> (N,N); its mean == mean(base)*mean(weight)
    return (sum_base / n) * (sum_w / n)


if __name__ == "__main__":
    key = jax.random.PRNGKey(0)
    k1, k2 = jax.random.split(key)

    # NCHW-style logits, as would come from a conv head
    x = jax.random.normal(k1, (2, 4, 16, 16), dtype=jnp.float32)
    target = (jax.random.uniform(k2, (2, 4, 16, 16)) > 0.5).astype(jnp.float32)

    out = jax.block_until_ready(binary_dual_focal_loss(x, target))

    # pure-JAX reference replicating the exact PyTorch math
    xf = x.reshape(-1)
    tf = target.reshape(-1)
    proba = jax.nn.sigmoid(xf)
    diff = jnp.abs(tf - proba)
    base = -(diff * jnp.log(1.0 - diff) ** 2)
    w = tf + 2.0
    ref = jnp.mean(base) * jnp.mean(w)   # == mean of the broadcast (N,N) loss

    assert jnp.allclose(out, ref, rtol=1e-5, atol=1e-6), (out, ref)
    print("KERNEL_OK")
</pallas_src>

<mosaic_0001>
module attributes {stable_mosaic.version = 11 : i64} {
  func.func @_focal_kernel(%arg0: i32, %arg1: i32, %arg2: memref<16x128xf32, #tpu.memory_space<vmem>>, %arg3: memref<16x128xf32, #tpu.memory_space<vmem>>, %arg4: memref<8x128xf32, #tpu.memory_space<vmem>>, %arg5: memref<8x128xf32, #tpu.memory_space<vmem>>) attributes {dimension_semantics = [#tpu.dimension_semantics<parallel>, #tpu.dimension_semantics<arbitrary>], iteration_bounds = array<i64: 1, 1>, scalar_prefetch = 0 : i64, scratch_operands = 0 : i64, tpu.core_type = #tpu.core_type<tc>, window_params = [{transform_indices = @transform_0, window_bounds = array<i64: 16, 128>}, {transform_indices = @transform_1, window_bounds = array<i64: 16, 128>}, {transform_indices = @transform_2, window_bounds = array<i64: 8, 128>}, {transform_indices = @transform_3, window_bounds = array<i64: 8, 128>}]} {
    %c0_i32 = arith.constant 0 : i32
    %0 = arith.cmpi eq, %arg1, %c0_i32 : i32
    %1 = arith.extui %0 : i1 to i32
    %c0_i32_0 = arith.constant 0 : i32
    %2 = arith.cmpi ne, %1, %c0_i32_0 : i32
    scf.if %2 {
      %cst_16 = arith.constant 0.000000e+00 : f32
      %29 = vector.broadcast %cst_16 : f32 to vector<8x128xf32>
      %c0_17 = arith.constant 0 : index
      %c0_18 = arith.constant 0 : index
      %30 = vector.load %arg4[%c0_17, %c0_18] : memref<8x128xf32, #tpu.memory_space<vmem>>, vector<8x128xf32>
      tpu.vector_store %arg4[%c0_17, %c0_18], %29 {strides = array<i32>} : memref<8x128xf32, #tpu.memory_space<vmem>>, vector<8x128xf32>,
      %cst_19 = arith.constant 0.000000e+00 : f32
      %31 = vector.broadcast %cst_19 : f32 to vector<8x128xf32>
      %c0_20 = arith.constant 0 : index
      %c0_21 = arith.constant 0 : index
      %32 = vector.load %arg5[%c0_20, %c0_21] : memref<8x128xf32, #tpu.memory_space<vmem>>, vector<8x128xf32>
      tpu.vector_store %arg5[%c0_20, %c0_21], %31 {strides = array<i32>} : memref<8x128xf32, #tpu.memory_space<vmem>>, vector<8x128xf32>,
    } else {
    }
    %c0 = arith.constant 0 : index
    %c0_1 = arith.constant 0 : index
    %3 = vector.load %arg2[%c0, %c0_1] : memref<16x128xf32, #tpu.memory_space<vmem>>, vector<16x128xf32>
    %c0_2 = arith.constant 0 : index
    %c0_3 = arith.constant 0 : index
    %4 = vector.load %arg3[%c0_2, %c0_3] : memref<16x128xf32, #tpu.memory_space<vmem>>, vector<16x128xf32>
    %5 = arith.negf %3 : vector<16x128xf32>
    %6 = math.exp %5 : vector<16x128xf32>
    %cst = arith.constant 1.000000e+00 : f32
    %7 = vector.broadcast %cst : f32 to vector<16x128xf32>
    %8 = arith.addf %7, %6 : vector<16x128xf32>
    %9 = arith.divf %7, %8 : vector<16x128xf32>
    %10 = arith.subf %4, %9 : vector<16x128xf32>
    %11 = math.absf %10 : vector<16x128xf32>
    %cst_4 = arith.constant 0.000000e+00 : f32
    %12 = vector.broadcast %cst_4 : f32 to vector<16x128xf32>
    %13 = arith.subf %12, %11 : vector<16x128xf32>
    %14 = math.log1p %13 : vector<16x128xf32>
    %15 = arith.mulf %14, %14 : vector<16x128xf32>
    %16 = arith.mulf %11, %15 : vector<16x128xf32>
    %cst_5 = arith.constant 0.000000e+00 : f32
    %17 = vector.broadcast %cst_5 : f32 to vector<16x128xf32>
    %18 = arith.subf %17, %16 : vector<16x128xf32>
    %c0_6 = arith.constant 0 : index
    %c0_7 = arith.constant 0 : index
    %19 = vector.load %arg4[%c0_6, %c0_7] : memref<8x128xf32, #tpu.memory_space<vmem>>, vector<8x128xf32>
    %20 = vector.shape_cast %18 : vector<16x128xf32> to vector<2x8x128xf32>
    %cst_8 = arith.constant dense<0.000000e+00> : vector<8x128xf32>
    %21 = vector.multi_reduction <add>, %20, %cst_8 [0] : vector<2x8x128xf32> to vector<8x128xf32>
    %22 = arith.addf %19, %21 : vector<8x128xf32>
    %c0_9 = arith.constant 0 : index
    %c0_10 = arith.constant 0 : index
    %23 = vector.load %arg4[%c0_9, %c0_10] : memref<8x128xf32, #tpu.memory_space<vmem>>, vector<8x128xf32>
    tpu.vector_store %arg4[%c0_9, %c0_10], %22 {strides = array<i32>} : memref<8x128xf32, #tpu.memory_space<vmem>>, vector<8x128xf32>,
    %c0_11 = arith.constant 0 : index
    %c0_12 = arith.constant 0 : index
    %24 = vector.load %arg5[%c0_11, %c0_12] : memref<8x128xf32, #tpu.memory_space<vmem>>, vector<8x128xf32>
    %25 = vector.shape_cast %4 : vector<16x128xf32> to vector<2x8x128xf32>
    %cst_13 = arith.constant dense<0.000000e+00> : vector<8x128xf32>
    %26 = vector.multi_reduction <add>, %25, %cst_13 [0] : vector<2x8x128xf32> to vector<8x128xf32>
    %27 = arith.addf %24, %26 : vector<8x128xf32>
    %c0_14 = arith.constant 0 : index
    %c0_15 = arith.constant 0 : index
    %28 = vector.load %arg5[%c0_14, %c0_15] : memref<8x128xf32, #tpu.memory_space<vmem>>, vector<8x128xf32>
    tpu.vector_store %arg5[%c0_14, %c0_15], %27 {strides = array<i32>} : memref<8x128xf32, #tpu.memory_space<vmem>>, vector<8x128xf32>,
    return
  }
  func.func @transform_0(%arg0: i32, %arg1: i32) -> (i32, i32) {
    %c1_i32 = arith.constant 1 : i32
    %0 = arith.muli %arg0, %c1_i32 : i32
    %1 = arith.addi %0, %arg1 : i32
    %c0_i32 = arith.constant 0 : i32
    %2 = arith.minsi %1, %c0_i32 : i32
    %c0_i32_0 = arith.constant 0 : i32
    %c0_i32_1 = arith.constant 0 : i32
    return %2, %c0_i32_0 : i32, i32
  }
  func.func @transform_1(%arg0: i32, %arg1: i32) -> (i32, i32) {
    %c1_i32 = arith.constant 1 : i32
    %0 = arith.muli %arg0, %c1_i32 : i32
    %1 = arith.addi %0, %arg1 : i32
    %c0_i32 = arith.constant 0 : i32
    %2 = arith.minsi %1, %c0_i32 : i32
    %c0_i32_0 = arith.constant 0 : i32
    %c0_i32_1 = arith.constant 0 : i32
    return %2, %c0_i32_0 : i32, i32
  }
  func.func @transform_2(%arg0: i32, %arg1: i32) -> (i32, i32) {
    %c0_i32 = arith.constant 0 : i32
    %c0_i32_0 = arith.constant 0 : i32
    return %arg0, %c0_i32 : i32, i32
  }
  func.func @transform_3(%arg0: i32, %arg1: i32) -> (i32, i32) {
    %c0_i32 = arith.constant 0 : i32
    %c0_i32_0 = arith.constant 0 : i32
    return %arg0, %c0_i32 : i32, i32
  }
}

</mosaic_0001>

<bundles_post_ra>
// kernel: tpu_custom_call.1
= control target key start
LH: loop header
LB: loop body
LE: loop exit
PB: predicated region body
PF: predicated region fallthrough
CT: control target
= control target key end

     0   :  { %9 = vsyncpa [#allocation3], 0  ;;  %s356_s0 = inlined_call_operand.hbm [shape: f32[16,128], index: 0, kind: input, shape index: {}]   ;;  %s357_s1 = inlined_call_operand.hbm [shape: f32[16,128], index: 1, kind: input, shape index: {}]   ;;  %s358_s2 = inlined_call_operand.hbm [shape: f32[8,128], index: 2, kind: output, shape index: {0}]   ;;  %s359_s3 = inlined_call_operand.hbm [shape: f32[8,128], index: 3, kind: output, shape index: {1}]  }
   0x1   :  { %10 = vsyncpa [#allocation6], 0 }
   0x2   :  { %11 = vsyncpa [#allocation4], 0 }
   0x3   :  { %12 = vsyncpa [#allocation9], 0  ;;  %s23_s14 = sshll.u32 %s356_s0, 4  ;;  %s316_s15 = smov [#allocation2]   ;;  %s24_s14 = int_to_ptr.hbm [resolvable:$true] %s23_s14 }
   0x4   :  { %s25_s16 = sshll.u32 %s316_s15, 4  ;;  %s42_s19 = sshll.u32 %s357_s1, 4  ;;  %s26_s16 = int_to_ptr.vmem [resolvable:$true] %s25_s16  ;;  %s43_s19 = int_to_ptr.hbm [resolvable:$true] %s42_s19 }
   0x5   :  { %s317_s20 = smov 128   ;;  %s318_s21 = smov 8  }
   0x6   :  { %31 = dma.hbm_to_vmem [thread:$0]  %s24_s14, 256, %s26_s16, [#allocation3], %s317_s20, %s317_s20, %s318_s21  }
   0x7   :  { %s319_s22 = smov [#allocation5]  }
   0x8   :  { %s44_s23 = sshll.u32 %s319_s22, 4  ;;  %s45_s23 = int_to_ptr.vmem [resolvable:$true] %s44_s23 }
   0x9   :  { %50 = dma.hbm_to_vmem [thread:$0]  %s43_s19, 256, %s45_s23, [#allocation6], %s317_s20, %s317_s20, %s318_s21  }
   0xa   :  { %308 = dma.done.wait [#allocation3], 256  }
   0xb   :  { %309 = vsyncadd [#allocation3], 4294967040 }
   0xc   :  { %310 = dma.done.wait [#allocation6], 256  }
   0xd   :  { %311 = vsyncadd [#allocation6], 4294967040  ;;  %v73_v0 = vld [vmem:[#allocation2] sm:$0xff]  ;;  %v74_v1 = vld [vmem:[#allocation2 + $0x8] sm:$0xff]  ;;  %s320_s0 = smov [#allocation8]   ;;  %s171_s26 = sshll.u32 %s359_s3, 4  ;;  %s172_s26 = int_to_ptr.hbm [resolvable:$true] %s171_s26 }
   0xe   :  { %v191_v2 = vmul.f32 -1.442695, %v73_v0  ;;  %v192_v3 = vmul.f32 -1.442695, %v74_v1  ;;  %v75_v14 = vld [vmem:[#allocation5] sm:$0xff]  ;;  %v76_v15 = vld [vmem:[#allocation5 + $0x8] sm:$0xff] }
   0xf   :  { %s169_s1 = sshll.u32 %s320_s0, 4  ;;  %v150_v20 = vadd.f32 %v76_v15, %v75_v14  ;;  %s321_s3 = smov [#allocation7]   ;;  %s170_s1 = int_to_ptr.vmem [resolvable:$true] %s169_s1 }
  0x10   :  { %200 = vpow2.f32 %v191_v2  ;;  %s158_s27 = sshll.u32 %s321_s3, 4  ;;  %s160_s30 = sshll.u32 %s358_s2, 4  ;;  %s159_s27 = int_to_ptr.vmem [resolvable:$true] %s158_s27  ;;  %s161_s30 = int_to_ptr.hbm [resolvable:$true] %s160_s30 }
  0x11   :  { %202 = vpow2.f32 %v192_v3  ;;  %152 = vst [vmem:[#allocation8] sm:$0xff] %v150_v20 }
  0x12   :  { %174 = dma.vmem_to_hbm [thread:$0]  %s170_s1, 128, %s172_s26, [#allocation9]  }
  0x16   :  { %v201_v4 = vpop.eup %200 }
  0x17   :  { %v203_v5 = vpop.eup %202  ;;  %v83_v6 = vadd.f32 1.0, %v201_v4 }
  0x18   :  { %v84_v7 = vadd.f32 1.0, %v203_v5 }
  0x19   :  { %204 = vrcp.f32 %v83_v6  ;;  %vm90_vm0 = vweird.f32 %v83_v6  ;;  %v94_v11 = vand.u32 2147483647, %v83_v6  ;;  %v96_v12 = vand.u32 2147483648, %v83_v6 }
  0x1a   :  { %206 = vrcp.f32 %v84_v7  ;;  %vm105_vm2 = vweird.f32 %v84_v7  ;;  %v111_v17 = vand.u32 2147483648, %v84_v7  ;;  %v109_v19 = vand.u32 2147483647, %v84_v7 }
  0x1b   :  { %v97_v22 = vor.u32 1.1754944e-38, %v96_v12  ;;  %vm95_vm5 = vcmp.eq.f32.partialorder %v94_v11, 8.507059e+37 }
  0x1c   :  { %v112_v25 = vor.u32 1.1754944e-38, %v111_v17  ;;  %vm110_vm7 = vcmp.eq.f32.partialorder %v109_v19, 8.507059e+37 }
  0x1f   :  { %v205_v8 = vpop.eup %204 }
  0x20   :  { %v207_v9 = vpop.eup %206  ;;  %v86_v10 = vmul.f32 %v205_v8, %v83_v6  ;;  %vm91_vm1 = vweird.f32 %v205_v8 }
  0x21   :  { %v101_v13 = vmul.f32 %v207_v9, %v84_v7  ;;  %vm106_vm3 = vweird.f32 %v207_v9  ;;  %vm92_vm4 = vmor %vm90_vm0, %vm91_vm1 }
  0x22   :  { %v87_v16 = vsub.f32 1.0, %v86_v10  ;;  %vm107_vm6 = vmor %vm105_vm2, %vm106_vm3 }
  0x23   :  { %v102_v18 = vsub.f32 1.0, %v101_v13 }
  0x24   :  { %v88_v21 = vmul.f32 %v205_v8, %v87_v16 }
  0x25   :  { %v103_v23 = vmul.f32 %v207_v9, %v102_v18 }
  0x26   :  { %v89_v24 = vadd.f32 %v205_v8, %v88_v21 }
  0x27   :  { %v104_v26 = vadd.f32 %v207_v9, %v103_v23 }
  0x28   :  { %v93_v27 = vsel %vm92_vm4, %v205_v8, %v89_v24 }
  0x29   :  { %v98_v28 = vsel %vm95_vm5, %v97_v22, %v93_v27  ;;  %v108_v29 = vsel %vm107_vm6, %v207_v9, %v104_v26 }
  0x2a   :  { %v113_v30 = vsel %vm110_vm7, %v112_v25, %v108_v29  ;;  %v115_v31 = vsub.f32 %v75_v14, %v98_v28 }
  0x2b   :  { %v116_v32 = vsub.f32 %v76_v15, %v113_v30 }
  0x2c   :  { %v117_v33 = vand.u32 2147483647, %v115_v31 }
  0x2d   :  { %v118_v34 = vand.u32 2147483647, %v116_v32 }
  0x2e   :  { %v119_v35 = vsub.f32 0.0, %v117_v33 }
  0x2f   :  { %v120_v36 = vsub.f32 0.0, %v118_v34 }
  0x30   :  { %v121_v37 = vadd.f32 1.0, %v119_v35  ;;  %v124_v38 = vmul.f32 -0.5, %v119_v35  ;;  %v127_v42 = vand.u32 2147483647, %v119_v35 }
  0x31   :  { %v130_v39 = vadd.f32 1.0, %v120_v36  ;;  %v133_v40 = vmul.f32 -0.5, %v120_v36  ;;  %v136_v44 = vand.u32 2147483647, %v120_v36 }
  0x32   :  { %208 = vlog2.f32 %v121_v37  ;;  %v125_v41 = vadd.f32 1.0, %v124_v38  ;;  %vm128_vm8 = vcmp.lt.f32.partialorder %v127_v42, 0.0004427343 }
  0x33   :  { %210 = vlog2.f32 %v130_v39  ;;  %v134_v43 = vadd.f32 1.0, %v133_v40  ;;  %vm137_vm9 = vcmp.lt.f32.partialorder %v136_v44, 0.0004427343 }
  0x34   :  { %v126_v45 = vmul.f32 %v125_v41, %v119_v35 }
  0x35   :  { %v135_v47 = vmul.f32 %v134_v43, %v120_v36 }
  0x38   :  { %v209_v46 = vpop.eup %208 }
  0x39   :  { %v211_v48 = vpop.eup %210  ;;  %v123_v49 = vmul.f32 0.6931472, %v209_v46 }
  0x3a   :  { %v132_v50 = vmul.f32 0.6931472, %v211_v48 }
  0x3b   :  { %v129_v51 = vsel %vm128_vm8, %v126_v45, %v123_v49 }
  0x3c   :  { %v138_v52 = vsel %vm137_vm9, %v135_v47, %v132_v50  ;;  %v139_v53 = vmul.f32 %v129_v51, %v129_v51 }
  0x3d   :  { %v140_v54 = vmul.f32 %v138_v52, %v138_v52 }
  0x3e   :  { %v141_v55 = vmul.f32 %v139_v53, %v117_v33 }
  0x3f   :  { %v142_v56 = vmul.f32 %v140_v54, %v118_v34 }
  0x40   :  { %v143_v57 = vsub.f32 0.0, %v141_v55 }
  0x41   :  { %v144_v58 = vsub.f32 0.0, %v142_v56 }
  0x43   :  { %v146_v59 = vadd.f32 %v144_v58, %v143_v57 }
  0x45   :  { %148 = vst [vmem:[#allocation7] sm:$0xff] %v146_v59 }
  0x46   :  { %163 = dma.vmem_to_hbm [thread:$0]  %s159_s27, 128, %s161_s30, [#allocation4]  }
  0x47   :  { %312 = dma.done.wait [#allocation4], 128  }
  0x48   :  { %313 = vsyncadd [#allocation4], 4294967168 }
  0x49   :  { %314 = dma.done.wait [#allocation9], 128  }
  0x4a   :  { %315 = vsyncadd [#allocation9], 4294967168 }
  0x4b   :  { %183 = vsyncpa [#allocation3], 1 }
  0x4c   :  { %184 = vsyncpa [#allocation6], 1 }
  0x4d   :  { %185 = vsyncpa [#allocation4], 1 }
  0x4e   :  { %186 = vsyncpa [#allocation9], 1 }

</bundles_post_ra>
